<compile_context>
chip_gen: v7x
topology: tpu7x:2x2x1
jax: 0.10.0
libtpu: 0.0.40
codegen_flags: <defaults>
</compile_context>

<pallas_src>
import math

import jax
import jax.numpy as jnp
from jax.experimental import pallas as pl
from jax.experimental.pallas import tpu as pltpu

_TWO_PI = 2.0 * math.pi


def _sinusoidal_kernel(x_ref, w_ref, o_ref):
    # x_ref: (Bt, 1) f32, w_ref: (1, half_dim) f32, o_ref: (2, Bt, half_dim) f32
    # Fold 2*pi onto the (Bt, 1) column first: a tiny vmul instead of a second
    # full (Bt, half_dim) multiply.
    x2pi = x_ref[...] * _TWO_PI            # (Bt, 1)
    freqs = x2pi * w_ref[...]              # (Bt, half_dim) broadcast VPU multiply
    # Two lane-dense stores (sin/cos stacked on the leading axis); sin/cos run
    # on the EUP in f32.
    o_ref[0] = jnp.sin(freqs).astype(o_ref.dtype)
    o_ref[1] = jnp.cos(freqs).astype(o_ref.dtype)


def random_or_learned_sinusoidal_pos_emb(x, weights, *, block_b=1024):
    """x: (B,) float, weights: (half_dim,) float -> (B, 1 + 2*half_dim) f32."""
    B = x.shape[0]
    half_dim = weights.shape[0]

    x2d = x.reshape(B, 1).astype(jnp.float32)
    w2d = weights.reshape(1, half_dim).astype(jnp.float32)

    out_shape = jax.ShapeDtypeStruct((2, B, half_dim), jnp.float32)

    if B > block_b and B % block_b == 0:
        # Production-sized batches: tile over B (multiple-of-8 row blocks),
        # keep the full feature dim per block, and let v7x split the batch
        # across its two TensorCores.  Per-buffer blocks stay well inside
        # VMEM even with double-buffering.
        sincos = pl.pallas_call(
            _sinusoidal_kernel,
            out_shape=out_shape,
            grid=(B // block_b,),
            in_specs=[
                pl.BlockSpec((block_b, 1), lambda i: (i, 0)),
                pl.BlockSpec((1, half_dim), lambda i: (0, 0)),
            ],
            out_specs=pl.BlockSpec((2, block_b, half_dim), lambda i: (0, i, 0)),
            compiler_params=pltpu.CompilerParams(
                dimension_semantics=("parallel",)),
        )(x2d, w2d)
    else:
        # Small batch: single VMEM-resident block, no grid, no per-step
        # bookkeeping.  Full-array specs are the default.
        sincos = pl.pallas_call(
            _sinusoidal_kernel,
            out_shape=out_shape,
        )(x2d, w2d)

    # Lane-misaligned [x | sin | cos] assembly stays in XLA so it can fuse
    # into whatever consumes the embedding.
    # TODO(synk): for realistic workloads, fuse this whole embedding into the
    # consumer kernel instead of a standalone pallas_call.
    return jnp.concatenate([x2d, sincos[0], sincos[1]], axis=-1)


if __name__ == "__main__":
    key = jax.random.PRNGKey(0)
    kx, kw = jax.random.split(key)

    dim = 32                      # module arg; must be even
    half_dim = dim // 2
    B = 8                         # batch of scalar (diffusion-timestep) inputs

    # Deterministic "parameter" init (stands in for torch.randn(half_dim)).
    weights = jax.random.normal(kw, (half_dim,), dtype=jnp.float32)
    # Realistic O(1) continuous-time timesteps; keeps sin/cos arguments small
    # enough that the comparison below is numerically meaningful.
    x = jax.random.uniform(kx, (B,), dtype=jnp.float32)

    out = random_or_learned_sinusoidal_pos_emb(x, weights)
    out = jax.block_until_ready(out)

    # Reference check in plain JAX (same math as the PyTorch forward).
    freqs_ref = x[:, None] * weights[None, :] * 2.0 * math.pi
    ref = jnp.concatenate(
        [x[:, None], jnp.sin(freqs_ref), jnp.cos(freqs_ref)], axis=-1
    )
    assert out.shape == (B, dim + 1)
    assert jnp.allclose(out, ref, atol=1e-4, rtol=1e-4), (
        f"max abs err = {jnp.max(jnp.abs(out - ref))}")

    print("KERNEL_OK")
</pallas_src>

<mosaic_0001>
module attributes {stable_mosaic.version = 11 : i64} {
  func.func @_sinusoidal_kernel(%arg0: memref<8x1xf32, #tpu.memory_space<vmem>>, %arg1: memref<1x16xf32, #tpu.memory_space<vmem>>, %arg2: memref<2x8x16xf32, #tpu.memory_space<vmem>>) attributes {dimension_semantics = [], scalar_prefetch = 0 : i64, scratch_operands = 0 : i64, tpu.core_type = #tpu.core_type<tc>} {
    %c0 = arith.constant 0 : index
    %c0_0 = arith.constant 0 : index
    %0 = vector.load %arg0[%c0, %c0_0] : memref<8x1xf32, #tpu.memory_space<vmem>>, vector<8x1xf32>
    %cst = arith.constant 6.28318548 : f32
    %1 = vector.broadcast %cst : f32 to vector<8x1xf32>
    %2 = arith.mulf %0, %1 : vector<8x1xf32>
    %c0_1 = arith.constant 0 : index
    %c0_2 = arith.constant 0 : index
    %3 = vector.load %arg1[%c0_1, %c0_2] : memref<1x16xf32, #tpu.memory_space<vmem>>, vector<1x16xf32>
    %4 = vector.broadcast %2 : vector<8x1xf32> to vector<8x16xf32>
    %5 = vector.broadcast %3 : vector<1x16xf32> to vector<8x16xf32>
    %6 = arith.mulf %4, %5 : vector<8x16xf32>
    %7 = math.sin %6 : vector<8x16xf32>
    %c0_3 = arith.constant 0 : index
    %c0_4 = arith.constant 0 : index
    %c0_5 = arith.constant 0 : index
    %8 = vector.load %arg2[%c0_3, %c0_4, %c0_5] : memref<2x8x16xf32, #tpu.memory_space<vmem>>, vector<1x8x16xf32>
    %9 = vector.shape_cast %8 : vector<1x8x16xf32> to vector<8x16xf32>
    %10 = vector.shape_cast %7 : vector<8x16xf32> to vector<1x8x16xf32>
    tpu.vector_store %arg2[%c0_3, %c0_4, %c0_5], %10 {strides = array<i32>} : memref<2x8x16xf32, #tpu.memory_space<vmem>>, vector<1x8x16xf32>,
    %11 = math.cos %6 : vector<8x16xf32>
    %c1 = arith.constant 1 : index
    %c0_6 = arith.constant 0 : index
    %c0_7 = arith.constant 0 : index
    %12 = vector.load %arg2[%c1, %c0_6, %c0_7] : memref<2x8x16xf32, #tpu.memory_space<vmem>>, vector<1x8x16xf32>
    %13 = vector.shape_cast %12 : vector<1x8x16xf32> to vector<8x16xf32>
    %14 = vector.shape_cast %11 : vector<8x16xf32> to vector<1x8x16xf32>
    tpu.vector_store %arg2[%c1, %c0_6, %c0_7], %14 {strides = array<i32>} : memref<2x8x16xf32, #tpu.memory_space<vmem>>, vector<1x8x16xf32>,
    return
  }
}

</mosaic_0001>

<bundles_post_ra>
// kernel: tpu_custom_call.1
= control target key start
LH: loop header
LB: loop body
LE: loop exit
PB: predicated region body
PF: predicated region fallthrough
CT: control target
= control target key end

     0   :  { %v306_v1 = vmov 0   ;;  %s372_s0 = inlined_call_operand.vmem [shape: f32[8,1], index: 0, kind: input, shape index: {}]   ;;  %s373_s1 = inlined_call_operand.vmem [shape: f32[1,16], index: 1, kind: input, shape index: {}]   ;;  %s374_s2 = inlined_call_operand.hbm [shape: f32[2,8,16], index: 2, kind: output, shape index: {}]  }
   0x1   :  { %v12_v0 = vld [vmem:[%s372_s0] sm:$0xff]  ;;  %277 = vset.pattern.permute.xlu0 %v306_v1 }
   0x2   :  { %v13_v2 = vmul.f32 6.2831855, %v12_v0 }
   0x4   :  { %17 = vperm.xlu0 %277, %v13_v2  }
   0x5   :  { %7 = vsyncpa [#allocation3], 0  ;;  %v254_v3 = vld [vmem:[%s373_s1] ss:$0 sm:$0xff]  ;;  %v307_v16 = vmov 683565275  }
   0x6   :  { %v308_v18 = vmov 2475754826   ;;  %v309_v21 = vmov 2131351028   ;;  %v310_v24 = vmov 2102212464  }
   0x7   :  { %v311_v27 = vmov 920167782   ;;  %v312_v30 = vmov 1326507024   ;;  %vm131_vm10 = vcmask 130048   ;;  %s313_s0 = smov [#allocation2]  }
   0x8   :  { %s243_s1 = sshll.u32 %s313_s0, 4  ;;  %s244_s1 = int_to_ptr.vmem [resolvable:$true] %s243_s1 }
   0x9   :  { %s282_s13 = scalar_lea.vmem %s244_s1, 256  ;;  %p287_p1 = scmp.lt.s32.totalorder %s244_s1, %s244_s1 }
   0xa   :  { %p283_p0 = scmp.ne.s32.totalorder %s244_s1, %s282_s13  ;;  %p288_p2 = scmp.lt.s32.totalorder %s282_s13, %s282_s13 }
   0xc   :  { %p289_p3 = por %p288_p2, %p287_p1 }
   0xe   :  { %p290_p4 = pnand %p289_p3, %p283_p0 }
  0x83   :  { %v18_v4 = vpop.permute.xlu0 %17 }
  0x84   :  { %v337_v5 = vmul.f32 %v254_v3, %v18_v4 }
  0x86   :  { %v30_v6 = vand.u32 2139095040, %v337_v5  ;;  %v27_v10 = vand.u32 2147483647, %v337_v5  ;;  %vm29_vm7 = vcmp.lt.s32.totalorder %v337_v5, 0 }
  0x88   :  { %v31_v7 = vshrl.u32 %v30_v6, 23  ;;  %v34_v13 = vand.u32 8388607, %v27_v10  ;;  %vm28_vm8 = vcmp.le.f32.partialorder %v27_v10, 0.7853982 }
  0x8a   :  { %v255_v8 = vadd.s32 4294967169, %v31_v7  ;;  %v35_v32 = vor.u32 8388608, %v34_v13 }
  0x8c   :  { %v37_v9 = vadd.s32 1, %v255_v8  ;;  %v75_v46 = vshll.u32 %v35_v32, 8 }
  0x8e   :  { %vm38_vm0 = vcmp.gt.s32.totalorder %v37_v9, 0 }
  0x8f   :  { %v39_v11 = vsel %vm38_vm0, %v37_v9, 0  ;;  %vm119_vm0 = vweird.f32 %v337_v5 }
  0x90   :  { %v41_v12 = vand.u32 31, %v39_v11  ;;  %v40_v15 = vshrl.u32 %v39_v11, 5 }
  0x92   :  { %v42_v14 = vsub.s32 32, %v41_v12  ;;  %v44_v17 = vshll.u32 %v307_v16, %v41_v12  ;;  %v47_v19 = vshll.u32 %v308_v18, %v41_v12  ;;  %v50_v23 = vshll.u32 %v309_v21, %v41_v12 }
  0x93   :  { %v53_v26 = vshll.u32 %v310_v24, %v41_v12  ;;  %v56_v29 = vshll.u32 %v311_v27, %v41_v12  ;;  %vm59_vm1 = vcmp.lt.s32.totalorder %v40_v15, 1  ;;  %vm62_vm2 = vcmp.lt.s32.totalorder %v40_v15, 4 }
  0x94   :  { %v45_v20 = vshrl.u32 %v308_v18, %v42_v14  ;;  %v48_v22 = vshrl.u32 %v309_v21, %v42_v14  ;;  %v51_v25 = vshrl.u32 %v310_v24, %v42_v14  ;;  %v54_v28 = vshrl.u32 %v311_v27, %v42_v14 }
  0x95   :  { %v57_v31 = vshrl.u32 %v312_v30, %v42_v14  ;;  %v43_v41 = vshrl.u32 %v307_v16, %v42_v14  ;;  %vm61_vm3 = vcmp.lt.s32.totalorder %v40_v15, 3  ;;  %vm60_vm4 = vcmp.lt.s32.totalorder %v40_v15, 2 }
  0x96   :  { %v46_v33 = vor.u32 %v45_v20, %v44_v17  ;;  %v49_v34 = vor.u32 %v48_v22, %v47_v19  ;;  %v52_v35 = vor.u32 %v51_v25, %v50_v23  ;;  %v55_v36 = vor.u32 %v54_v28, %v53_v26 }
  0x97   :  { %v58_v37 = vor.u32 %v57_v31, %v56_v29 }
  0x98   :  { %v64_v38 = vsel %vm62_vm2, %v52_v35, 2102212464  ;;  %v67_v39 = vsel %vm59_vm1, %v46_v33, %v49_v34  ;;  %v71_v40 = vsel %vm59_vm1, %v49_v34, %v52_v35  ;;  %v68_v42 = vsel %vm62_vm2, %v55_v36, 920167782 }
  0x99   :  { %v72_v43 = vsel %vm62_vm2, %v58_v37, 1326507024  ;;  %v69_v44 = vsel %vm61_vm3, %v52_v35, %v68_v42  ;;  %v63_v47 = vsel %vm59_vm1, %v43_v41, %v46_v33  ;;  %v65_v48 = vsel %vm61_vm3, %v49_v34, %v64_v38 }
  0x9a   :  { %v73_v45 = vsel %vm61_vm3, %v55_v36, %v72_v43  ;;  %v70_v49 = vsel %vm60_vm4, %v67_v39, %v69_v44  ;;  %v66_v55 = vsel %vm60_vm4, %v63_v47, %v65_v48 }
  0x9b   :  { %v74_v50 = vsel %vm60_vm4, %v71_v40, %v73_v45  ;;  %v346_v53 = vmul.u32.u64.low %v75_v46, %v70_v49  ;;  %v347_v54 = vmul.u32.u64.high %v75_v46, %v70_v49, %v346_v53  ;;  %v82_v57 = vmul.u32 %v75_v46, %v66_v55 }
  0x9c   :  { %v343_v51 = vmul.u32.u64.low %v75_v46, %v74_v50  ;;  %v344_v52 = vmul.u32.u64.high %v75_v46, %v74_v50, %v343_v51 }
  0x9d   :  { %v85_v56 = vadd.s32 1, %v347_v54 }
  0x9e   :  { %vm84_vm5 = vc.u32 %v344_v52, %v346_v53  ;;  %v83_v6 = vadd.s32 %v346_v53, %v344_v52 }
  0x9f   :  { %v86_v58 = vsel %vm84_vm5, %v85_v56, %v347_v54 }
  0xa0   :  { %v87_v59 = vadd.s32 %v86_v58, %v82_v57 }
  0xa2   :  { %v88_v60 = vadd.s32 536870912, %v87_v59 }
  0xa4   :  { %v89_v61 = vshrl.u32 %v88_v60, 30 }
  0xa6   :  { %v90_v62 = vshll.u32 %v89_v61, 30  ;;  %v113_v19 = vsub.s32 4, %v89_v61 }
  0xa8   :  { %v91_v63 = vsub.s32 %v87_v59, %v90_v62  ;;  %v114_v22 = vsel %vm29_vm7, %v113_v19, %v89_v61 }
  0xa9   :  { %v116_v24 = vsel %vm28_vm8, 0, %v114_v22 }
  0xaa   :  { %v93_v0 = vsub.s32 0, %v91_v63  ;;  %v120_v25 = vadd.s32 3, %v116_v24  ;;  %v226_v26 = vand.u32 3, %v116_v24 }
  0xac   :  { %v256_v1 = vmin.u32 %v93_v0, %v91_v63  ;;  %v121_v27 = vand.u32 3, %v120_v25  ;;  %vm231_vm11 = vcmp.eq.s32.totalorder %v226_v26, 2  ;;  %vm228_vm13 = vcmp.eq.s32.totalorder %v226_v26, 0 }
  0xad   :  { %vm227_vm15 = vcmp.lt.s32.totalorder %v226_v26, 2 }
  0xae   :  { %v95_v2 = vclz %v256_v1  ;;  %vm126_vm9 = vcmp.eq.s32.totalorder %v121_v27, 2  ;;  %vm123_vm12 = vcmp.eq.s32.totalorder %v121_v27, 0  ;;  %vm122_vm14 = vcmp.lt.s32.totalorder %v121_v27, 2 }
  0xb0   :  { %v257_v3 = vadd.s32 4294967294, %v95_v2 }
  0xb2   :  { %vm258_vm6 = vcmp.lt.s32.totalorder %v257_v3, 0 }
  0xb3   :  { %v98_v4 = vsel %vm258_vm6, 0, %v257_v3 }
  0xb4   :  { %v99_v7 = vsub.s32 32, %v98_v4  ;;  %v103_v8 = vsub.s32 4294967266, %v98_v4  ;;  %v100_v9 = vshll.u32 %v91_v63, %v98_v4 }
  0xb6   :  { %v101_v11 = vshrl.u32 %v83_v6, %v99_v7  ;;  %v104_v12 = vadd.s32 127, %v103_v8 }
  0xb8   :  { %v102_v13 = vor.u32 %v101_v11, %v100_v9  ;;  %v105_v14 = vshll.u32 %v104_v12, 23 }
  0xba   :  { %v106_v15 = vor.u32 4788187, %v105_v14  ;;  %v109_v17 = vcvt.s32.f32 %v102_v13 }
  0xbc   :  { %v107_v16 = vand.u32 2147483647, %v106_v15 }
  0xbe   :  { %v110_v18 = vmul.f32 %v109_v17, %v107_v16 }
  0xc0   :  { %v111_v20 = vxor.u32 2147483648, %v110_v18 }
  0xc2   :  { %v112_v21 = vsel %vm29_vm7, %v111_v20, %v110_v18 }
  0xc3   :  { %v115_v23 = vsel %vm28_vm8, %v337_v5, %v112_v21 }
  0xc4   :  { %278 = vcosq.f32 %v115_v23 }
  0xc5   :  { %280 = vsinq.f32 %v115_v23 }
  0xce   :  { %v279_v28 = vpop.eup %278 }
  0xcf   :  { %v281_v29 = vpop.eup %280  ;;  %v127_v30 = vxor.u32 2147483648, %v279_v28 }
  0xd0   :  { %v124_v31 = vxor.u32 2147483648, %v281_v29 }
  0xd1   :  { %v128_v10 = vsel %vm126_vm9, %v127_v30, %v281_v29  ;;  %v233_v32 = vsel %vm231_vm11, %v127_v30, %v281_v29 }
  0xd2   :  { %v125_v33 = vsel %vm123_vm12, %v279_v28, %v124_v31  ;;  %v230_v34 = vsel %vm228_vm13, %v279_v28, %v124_v31 }
  0xd3   :  { %v129_v35 = vsel %vm122_vm14, %v125_v33, %v128_v10  ;;  %v234_v36 = vsel %vm227_vm15, %v230_v34, %v233_v32 }
  0xd4   :  { %v130_v37 = vsel %vm119_vm0, nan, %v129_v35  ;;  %v235_v38 = vsel %vm119_vm0, nan, %v234_v36 }
  0xd5   :  { %132 = vst.msk [vmem:[#allocation2] sm:$0xff] %vm131_vm10, %v130_v37  ;;  %237 = vst.msk [vmem:[#allocation2 + $0x8] sm:$0xff] %vm131_vm10, %v235_v38 }
  0xd6   :  { %293 = shalt.err (!%p290_p4)
}
  0xd7   :  { %s294_s16 = scalar_lea.hbm %s374_s2, 256 }
  0xd8   :  { %p295_p5 = scmp.ne.s32.totalorder %s374_s2, %s294_s16  ;;  %p298_p6 = scmp.lt.u32.totalorder %s294_s16, %s374_s2 }
  0xda   :  { %p300_p7 = pnand %p298_p6, %p295_p5 }
  0xdc   :  { %303 = shalt.err (!%p300_p7)
}
  0xdd   :  { %s314_s21 = smov 128   ;;  %s315_s22 = smov 8  }
  0xde   :  { %249 = dma.vmem_to_hbm [thread:$0]  %s244_s1, 256, %s374_s2, [#allocation3], %s314_s21, %s314_s21, %s315_s22  }
  0xdf   :  { %304 = dma.done.wait [#allocation3], 256  }
  0xe0   :  { %305 = vsyncadd [#allocation3], 4294967040 }
  0xe1   :  { %253 = vsyncpa [#allocation3], 1 }

</bundles_post_ra>
